<compile_context>
chip_gen: v7x
topology: tpu7x:2x2x1
jax: 0.10.0
libtpu: 0.0.40
codegen_flags: <defaults>
</compile_context>

<pallas_src>
import functools

import jax
import jax.numpy as jnp
from jax.experimental import pallas as pl
from jax.experimental.pallas import tpu as pltpu

_NUM_CHANNELS = 3  # the module hard-codes torch.randperm(3)


def _copy_kernel(perm_ref, x_ref, o_ref):
    # The input block was already gathered from channel perm[c] by the index_map;
    # the body is a pure copy (auto-pipelined HBM->VMEM->HBM).
    del perm_ref
    o_ref[...] = x_ref[...]


def _rows_per_block(H, W, itemsize, target_bytes=2 << 20):
    """H-tile so each block is ~2 MiB, full-W, sublane-aligned (mult. of 8 or full H)."""
    rows = max(1, target_bytes // max(1, W * itemsize))
    if rows >= H:
        return H
    rows = max(8, (rows // 8) * 8)
    return min(rows, H)


def channel_permute(image: jax.Array, perm: jax.Array) -> jax.Array:
    """out[n, c, :, :] = image[n, perm[c], :, :] via the BlockSpec auto-pipeline."""
    N, C, H, W = image.shape
    assert C == _NUM_CHANNELS, f"expected {_NUM_CHANNELS} channels, got {C}"

    th = _rows_per_block(H, W, image.dtype.itemsize)
    grid = (N, C, pl.cdiv(H, th))

    grid_spec = pltpu.PrefetchScalarGridSpec(
        num_scalar_prefetch=1,  # perm -> SMEM, passed positionally to index_maps
        grid=grid,
        in_specs=[
            pl.BlockSpec(
                (1, 1, th, W),
                # Gather: read channel perm[c] of image n, H-tile h.
                lambda n, c, h, p_ref: (n, p_ref[c], h, 0),
            )
        ],
        out_specs=pl.BlockSpec(
            (1, 1, th, W),
            lambda n, c, h, p_ref: (n, c, h, 0),
        ),
    )

    return pl.pallas_call(
        _copy_kernel,
        out_shape=jax.ShapeDtypeStruct(image.shape, image.dtype),
        grid_spec=grid_spec,
        compiler_params=pltpu.CompilerParams(
            dimension_semantics=("parallel", "parallel", "parallel")
        ),
        cost_estimate=pl.CostEstimate(
            flops=0,
            transcendentals=0,
            bytes_accessed=2 * image.size * image.dtype.itemsize,
        ),
    )(perm, image)


@functools.partial(jax.jit, static_argnames=("p",), donate_argnums=(0,))
def random_channel_swap(image: jax.Array, key: jax.Array, p: float = 0.5) -> jax.Array:
    """JAX equivalent of RandomChannelSwap.forward (p fixed at trace time).

    `image` is donated: the identity branch aliases the input buffer (no copy).
    """
    assert 0.0 <= p <= 1.0
    k_coin, k_perm = jax.random.split(key)
    do_swap = jax.random.uniform(k_coin, ()) < p
    identity = jnp.arange(_NUM_CHANNELS, dtype=jnp.int32)
    rand_perm = jax.random.permutation(k_perm, identity)
    perm = jnp.where(do_swap, rand_perm, identity).astype(jnp.int32)

    # Skip the Pallas launch entirely when the effective permutation is the
    # identity (coin did not fire, or randperm drew the identity).
    needs_copy = jnp.any(perm != identity)
    return jax.lax.cond(
        needs_copy,
        lambda img: channel_permute(img, perm),
        lambda img: img,
        image,
    )


if __name__ == "__main__":
    key = jax.random.PRNGKey(0)
    k_img, k_aug = jax.random.split(key)

    # Small NCHW image with 3 channels (the module hard-codes randperm(3)).
    image = jax.random.normal(k_img, (2, 3, 16, 16), dtype=jnp.float32)

    # 1) Directly exercise the Pallas kernel with a fixed non-identity perm.
    fixed_perm = jnp.array([2, 0, 1], dtype=jnp.int32)
    out_fixed = jax.block_until_ready(channel_permute(image, fixed_perm))
    assert jnp.array_equal(out_fixed, image[:, fixed_perm, :, :]), "fixed-perm mismatch"

    # 2) Same kernel on a uint8 image.
    img_u8 = jax.random.randint(k_img, (2, 3, 16, 16), 0, 255).astype(jnp.uint8)
    out_u8 = jax.block_until_ready(channel_permute(img_u8, fixed_perm))
    assert jnp.array_equal(out_u8, img_u8[:, fixed_perm, :, :]), "uint8 mismatch"

    # 3) Full random path (p=0.5) vs a pure-JAX reference using the same draws.
    #    (pass copies because the jitted function donates its image argument)
    out = jax.block_until_ready(random_channel_swap(jnp.copy(image), k_aug, p=0.5))
    k_coin, k_perm = jax.random.split(k_aug)
    do_swap = jax.random.uniform(k_coin, ()) < 0.5
    rand_perm = jax.random.permutation(k_perm, jnp.arange(3, dtype=jnp.int32))
    perm = jnp.where(do_swap, rand_perm, jnp.arange(3, dtype=jnp.int32))
    assert jnp.array_equal(out, image[:, perm, :, :]), "p=0.5 mismatch vs reference"

    # 4) p=0 is always a pass-through; p=1 always applies rand_perm.
    out_p0 = jax.block_until_ready(random_channel_swap(jnp.copy(image), k_aug, p=0.0))
    assert jnp.array_equal(out_p0, image), "p=0.0 should be identity"
    out_p1 = jax.block_until_ready(random_channel_swap(jnp.copy(image), k_aug, p=1.0))
    assert jnp.array_equal(out_p1, image[:, rand_perm, :, :]), "p=1.0 mismatch"

    print("KERNEL_OK")
</pallas_src>

<mosaic_0001>
module attributes {stable_mosaic.version = 11 : i64} {
  func.func @_copy_kernel(%arg0: i32, %arg1: i32, %arg2: i32, %arg3: memref<3xi32, #tpu.memory_space<smem>>, %arg4: memref<1x1x16x16xf32, #tpu.memory_space<vmem>>, %arg5: memref<1x1x16x16xf32, #tpu.memory_space<vmem>>) attributes {dimension_semantics = [#tpu.dimension_semantics<parallel>, #tpu.dimension_semantics<parallel>, #tpu.dimension_semantics<parallel>], iteration_bounds = array<i64: 2, 3, 1>, scalar_prefetch = 1 : i64, scratch_operands = 0 : i64, tpu.core_type = #tpu.core_type<tc>, window_params = [{transform_indices = @transform_0, window_bounds = array<i64: 1, 1, 16, 16>}, {transform_indices = @transform_1, window_bounds = array<i64: 1, 1, 16, 16>}]} {
    %c0 = arith.constant 0 : index
    %c0_0 = arith.constant 0 : index
    %c0_1 = arith.constant 0 : index
    %c0_2 = arith.constant 0 : index
    %0 = vector.load %arg4[%c0, %c0_0, %c0_1, %c0_2] : memref<1x1x16x16xf32, #tpu.memory_space<vmem>>, vector<1x1x16x16xf32>
    %c0_3 = arith.constant 0 : index
    %c0_4 = arith.constant 0 : index
    %c0_5 = arith.constant 0 : index
    %c0_6 = arith.constant 0 : index
    %1 = vector.load %arg5[%c0_3, %c0_4, %c0_5, %c0_6] : memref<1x1x16x16xf32, #tpu.memory_space<vmem>>, vector<1x1x16x16xf32>
    tpu.vector_store %arg5[%c0_3, %c0_4, %c0_5, %c0_6], %0 {strides = array<i32>} : memref<1x1x16x16xf32, #tpu.memory_space<vmem>>, vector<1x1x16x16xf32>,
    return
  }
  func.func @transform_0(%arg0: i32, %arg1: i32, %arg2: i32, %arg3: memref<3xi32, #tpu.memory_space<smem>>) -> (i32, i32, i32, i32) {
    %0 = arith.index_cast %arg1 : i32 to index
    %1 = memref.load %arg3[%0] : memref<3xi32, #tpu.memory_space<smem>>
    %c0_i32 = arith.constant 0 : i32
    %c0_i32_0 = arith.constant 0 : i32
    return %arg0, %1, %arg2, %c0_i32 : i32, i32, i32, i32
  }
  func.func @transform_1(%arg0: i32, %arg1: i32, %arg2: i32, %arg3: memref<3xi32, #tpu.memory_space<smem>>) -> (i32, i32, i32, i32) {
    %c0_i32 = arith.constant 0 : i32
    %c0_i32_0 = arith.constant 0 : i32
    return %arg0, %arg1, %arg2, %c0_i32 : i32, i32, i32, i32
  }
}

</mosaic_0001>

<bundles_post_ra>
// kernel: tpu_custom_call.1
= control target key start
LH: loop header
LB: loop body
LE: loop exit
PB: predicated region body
PF: predicated region fallthrough
CT: control target
= control target key end

     0   :  { %s855_s0 = inlined_call_operand.hbm [shape: s32[3], index: 0, kind: input, shape index: {}]   ;;  %s856_s1 = inlined_call_operand.hbm [shape: f32[2,3,16,16], index: 1, kind: input, shape index: {}]   ;;  %s857_s2 = inlined_call_operand.hbm [shape: f32[2,3,16,16], index: 2, kind: output, shape index: {}]  }
   0x1   :  { %s425_s11 = scalar_lea.hbm %s855_s0, 16 }
   0x2   :  { %p426_p0 = scmp.ne.s32.totalorder %s855_s0, %s425_s11  ;;  %p429_p1 = scmp.lt.u32.totalorder %s425_s11, %s855_s0 }
   0x4   :  { %p431_p2 = pnand %p429_p1, %p426_p0 }
   0x6   :  { %434 = shalt.err (!%p431_p2)  }
   0x7   :  { %s591_s16 = smov [#allocation3]  }
   0x8   :  { %8 = dma.hbm_to_smem %s855_s0, 16, %s591_s16, [#allocation2] }
   0x9   :  { %537 = dma.done.wait [#allocation2], 16 }
   0xa   :  { %538 = vsyncadd [#allocation2], 4294967280 }
   0xb   :  { %10 = sfence }
   0xc   :  { %11 = vsyncpa [#allocation5], 0 }
   0xd   :  { %13 = vsyncpa [#allocation5 + $0x1], 0 }
   0xe   :  { %14 = vsyncpa [#allocation6], 0 }
   0xf   :  { %16 = vsyncpa [#allocation6 + $0x1], 0  ;;  %s625_s19 = smov 0   ;;  %s627_s20 = smov 0  }
  0x10   :  { %s629_s21 = smov 0   ;;  %s631_s22 = smov 0  }
  0x11   :  { %s633_s23 = smov 0   ;;  %s635_s24 = smov 0  }
  0x12   :  { %s637_s0 = smov 0   ;;  %s639_s25 = smov 0  }
  0x13   :  { %s641_s26 = smov 0   ;;  %s643_s27 = smov 0  }
  0x14   :  { %s645_s28 = smov 0  }
  0x15 LB: > { %863 = sst [smem:[#allocation13_spill]] %s581_s26  ;;  %s297_s29 = sadd.s32 4294967295, %s589_s28   ;;  %s589_s28 = sphi %s645_s28, %s22_s28   ;;  %s585_s27 = sphi %s643_s27, %s886_s27   ;;  %s581_s26 = sphi %s641_s26, %s877_s26   ;;  %s577_s25 = sphi %s639_s25, %s885_s25   ;;  %s573_s0 = sphi %s637_s0, %s876_s0   ;;  %s569_s24 = sphi %s635_s24, %s884_s24   ;;  %s565_s23 = sphi %s633_s23, %s883_s23   ;;  %s561_s22 = sphi %s631_s22, %s882_s22   ;;  %s557_s21 = sphi %s629_s21, %s881_s21   ;;  %s553_s20 = sphi %s627_s20, %s880_s20   ;;  %s549_s19 = sphi %s625_s19, %s879_s19  }
  0x16   : > { %s298_s30 = sadd.s32 4294967294, %s589_s28   ;;  %s37_s3 = sadd.s32 1, %s581_s26 }
  0x17   : > { %p39_p3 = scmp.ge.s32.totalorder %s37_s3, 3  ;;  %s41_s4 = sadd.s32 1, %s585_s27 }
  0x18   : > { %s45_s5 = sld [smem:[#allocation3 + %s581_s26]]  ;;  %s54_s6 = sadd.s32 1, %s569_s24 }
  0x19   : > { %s888_s3 = smov (%p39_p3, %s37_s3), 0  ;;  %s890_s4 = smov (!%p39_p3, %s41_s4), %s585_s27 }
  0x1a   : > { %864 = sst [smem:[#allocation14_spill]] %s888_s3  ;;  %p61_p4 = scmp.ne.s32.totalorder %s569_s24, %s565_s23 }
  0x1b   : > { %s46_s7 = sld [smem:[#allocation3 + %s888_s3]]  ;;  %p43_p5 = scmp.ge.s32.totalorder %s890_s4, 2 }
  0x1c   : > { %p67_p6 = scmp.ne.s32.totalorder %s565_s23, %s561_s22  ;;  %p62_p7 = scmp.eq.s32.totalorder %s589_s28, 0 }
  0x1d   : > { %p68_p8 = scmp.eq.s32.totalorder %s297_s29, 0  ;;  %s892_s4 = smov (%p43_p5, %s890_s4), 0 }
  0x1e   : > { %865 = sst [smem:[#allocation15_spill]] %s892_s4  ;;  %s78_s9 = ssub.s32 %s581_s26, %s888_s3 }
  0x1f   : > { %p694_p9 = por %p68_p8, %p67_p6  ;;  %s47_s10 = ssub.s32 %s585_s27, %s892_s4 }
  0x20   : > { %s84_s11 = sadd.s32 1, %s557_s21  ;;  %s79_s13 = sor.u32 %s78_s9, %s47_s10 }
  0x21   : > { %s866_s8 = scalar_select %p694_p9, 1, 0 }
  0x22   : > { %s48_s12 = ssub.s32 %s45_s5, %s46_s7  ;;  %p82_p10 = scmp.eq.s32.totalorder %s79_s13, 0 }
  0x23   : > { %s49_s14 = sor.u32 %s48_s12, %s47_s10  ;;  %p94_p12 = scmp.ne.s32.totalorder %s557_s21, %s553_s20 }
  0x24   : > { %p52_p11 = scmp.eq.s32.totalorder %s49_s14, 0  ;;  %p95_p13 = scmp.eq.s32.totalorder %s297_s29, 5 }
  0x25   : > { %s706_s15 = scalar_select %p82_p10, %s557_s21, %s84_s11  }
  0x26   : > { %s709_s16 = scalar_select %p52_p11, %s569_s24, %s54_s6  }
  0x27   : > { %p100_p0 = scmp.ne.s32.totalorder %s553_s20, %s549_s19  ;;  %p101_p1 = scmp.eq.s32.totalorder %s298_s30, 5 }
  0x28   : > { %867 = sst [smem:[#allocation16_spill]] %s709_s16  ;;  %p63_p2 = por %p62_p7, %p61_p4 }
  0x29   : > { %p720_p3 = por %p95_p13, %p94_p12  ;;  %p724_p5 = por %p101_p1, %p100_p0 }
  0x2a   : > { %s121_s22 = sand.u32 1, %s569_s24   ;;  %p330_p6 = scmp.lt.s32.totalorder %s589_s28, 6 }
  0x2b   : > { %s868_s17 = scalar_select %p720_p3, 1, 0 }
  0x2c   : > { %s869_s18 = scalar_select %p724_p5, 1, 0 }
  0x2d   : > { %s301_s29 = sshll.u32 %s121_s22, 4  ;;  %p731_p8 = pnand %p330_p6, %p63_p2 }
  0x2e   : > { %s314_s5 = scalar_select %p63_p2, [#allocation3], [#allocation8] }
  0x2f   : > { %s315_s6 = scalar_select %p63_p2, %s581_s26, 0 }
  0x30   : > { %s894_s5 = smov (!%p330_p6, %s314_s5), [#allocation9]  ;;  %s125_s9 = scalar_lea.vmem [#allocation4], %s301_s29 }
  0x31   : > { %s896_s6 = smov (!%p330_p6, %s315_s6), 0  ;;  %s137_s10 = sshll.u32 %s125_s9, 4  ;;  %s738_s10 = int_to_ptr.vmem [resolvable:$true] %s137_s10 }
  0x32   : > { %s126_s7 = sld [smem:[%s894_s5 + %s896_s6]]  ;;  %p304_p4 = scmp.ge.s32.totalorder %s589_s28, 1 }
  0x33   : > { %s312_s11 = smul.u32 6, %s585_s27  ;;  %p145_p7 = scmp.lt.s32.totalorder %s589_s28, 7 }
  0x34   : > { %s749_s29 = scalar_lea.sflag [#allocation5], %s121_s22  ;;  %p437_p12 = pneg %p731_p8 }
  0x35   : > { %p740_p10 = pnand %p304_p4, %p145_p7  ;;  %s440_s26 = scalar_lea.hbm %s856_s1, 1536 }
  0x38   : > { %s302_s13 = sshll.u32 %s126_s7, 1 }
  0x39   : > { %s134_s14 = sadd.s32 %s312_s11, %s302_s13 }
  0x3a   : > { %s303_s4 = sshll.u32 %s134_s14, 7 }
  0x3b   : > { %s747_s16 = scalar_lea.hbm %s856_s1, %s303_s4 }
  0x3c   : > { %s435_s5 = scalar_lea.hbm %s747_s16, 256  ;;  %p441_p1 = scmp.lt.u32.totalorder %s747_s16, %s856_s1 }
  0x3d   : > { %p436_p11 = scmp.ne.s32.totalorder %s747_s16, %s435_s5  ;;  %p442_p2 = scmp.lt.u32.totalorder %s440_s26, %s435_s5 }
  0x3e   : > { %p444_p4 = scmp.lt.u32.totalorder %s435_s5, %s747_s16 }
  0x3f   : > { %p438_p13 = pnand %p437_p12, %p436_p11  ;;  %p443_p6 = por %p442_p2, %p441_p1 }
  0x41   : > { %p439_p0 = pneg %p438_p13  ;;  %p445_p7 = por %p444_p4, %p443_p6 }
  0x43   : > { %p446_p5 = pnand %p445_p7, %p439_p0 }
  0x45   : > { %449 = shalt.err (!%p446_p5)
}
  0x46   : > { %s450_s22 = scalar_lea.vmem %s738_s10, 256  ;;  %s592_s9 = smov [#allocation4]  }
  0x47   : > { %p451_p11 = scmp.ne.s32.totalorder %s738_s10, %s450_s22  ;;  %s455_s11 = sshll.u32 %s592_s9, 4  ;;  %s456_s11 = int_to_ptr.vmem [resolvable:$false] %s455_s11 }
  0x48   : > { %s457_s13 = scalar_lea.vmem %s456_s11, 512  ;;  %p458_p9 = scmp.lt.s32.totalorder %s738_s10, %s456_s11 }
  0x49   : > { %p453_p13 = pnand %p451_p11, %p437_p12  ;;  %p459_p1 = scmp.lt.s32.totalorder %s457_s13, %s450_s22 }
  0x4b   : > { %p454_p3 = pneg %p453_p13  ;;  %p460_p2 = por %p459_p1, %p458_p9 }
  0x4d   : > { %p461_p6 = pnand %p460_p2, %p454_p3 }
  0x4f   : > { %464 = shalt.err (!%p461_p6)
}
  0x50   : > { %s593_s14 = smov 128   ;;  %s594_s5 = smov 8  }
  0x51   : > { %325 = dma.hbm_to_vmem [thread:$0]  (!%p731_p8), %s747_s16, 256, %s738_s10, %s749_s29, %s593_s14, %s593_s14, %s594_s5  }
  0x52   : > { %149 = sbr.rel (%p740_p10) target bundleno = 119 (0x77), region = 24  ;;  %s151_s6 = sand.u32 (!%p740_p10), 1, %s565_s23  }
  0x53   : > { %s305_s7 = sshll.u32 (!%p740_p10), %s151_s6, 4  ;;  %s152_s26 = scalar_lea.sflag (!%p740_p10), [#allocation5], %s151_s6 }
  0x54   : > { %s155_s3 = scalar_lea.vmem (!%p740_p10), [#allocation4], %s305_s7  ;;  %p872_p9 = scmp.ne.s32.totalorder (!%p740_p10), %s866_s8, 0 }
  0x59   : > { %540 = dma.done.wait (%p872_p9), %s152_s26, 256  }
  0x5a   : > { %542 = vsyncadd (%p872_p9), %s152_s26, 4294967040  ;;  %s171_s4 = sand.u32 1, %s553_s20   ;;  %s308_s16 = sshll.u32 %s573_s0, 1  ;;  %vm179_vm0 = vcmask 130048   ;;  %v177_v0 = vld [vmem:[%s155_s3] sm:$0xff]  ;;  %v178_v1 = vld [vmem:[%s155_s3 + $0x8] sm:$0xff] }
  0x5b   : > { %s306_s30 = sshll.u32 %s171_s4, 4  ;;  %s313_s10 = smul.u32 6, %s577_s25 }
  0x5c   : > { %s173_s12 = scalar_lea.vmem [#allocation7], %s306_s30  ;;  %s794_s0 = scalar_lea.sflag [#allocation6], %s171_s4 }
  0x5d   : > { %s200_s29 = sshll.u32 %s173_s12, 4  ;;  %s197_s22 = sadd.s32 %s313_s10, %s308_s16  ;;  %180 = vst.msk [vmem:[%s173_s12] sm:$0xff] %vm179_vm0, %v177_v0  ;;  %181 = vst.msk [vmem:[%s173_s12 + $0x8] sm:$0xff] %vm179_vm0, %v178_v1  ;;  %s787_s29 = int_to_ptr.vmem [resolvable:$true] %s200_s29 }
  0x5e   : > { %s309_s9 = sshll.u32 %s197_s22, 7  ;;  %s465_s25 = scalar_lea.vmem %s787_s29, 256 }
  0x5f   : > { %s792_s13 = scalar_lea.hbm %s857_s2, %s309_s9  ;;  %p466_p3 = scmp.ne.s32.totalorder %s787_s29, %s465_s25 }
  0x60   : > { %p873_p5 = scmp.ne.s32.totalorder %s868_s17, 0  ;;  %s595_s14 = smov [#allocation7]  }
  0x61   : > { %s469_s5 = sshll.u32 %s595_s14, 4  ;;  %s470_s5 = int_to_ptr.vmem [resolvable:$false] %s469_s5 }
  0x62   : > { %p467_p8 = pnand %p466_p3, %p873_p5  ;;  %s471_s6 = scalar_lea.vmem %s470_s5, 512 }
  0x63   : > { %p472_p12 = scmp.lt.s32.totalorder %s787_s29, %s470_s5  ;;  %p473_p0 = scmp.lt.s32.totalorder %s471_s6, %s465_s25 }
  0x64   : > { %p468_p10 = pneg %p467_p8 }
  0x65   : > { %p474_p4 = por %p473_p0, %p472_p12 }
  0x67   : > { %p475_p7 = pnand %p474_p4, %p468_p10 }
  0x69   : > { %478 = shalt.err (!%p475_p7)
}
  0x6a   : > { %s479_s7 = scalar_lea.hbm %s792_s13, 256  ;;  %s483_s4 = scalar_lea.hbm %s857_s2, 1536 }
  0x6b   : > { %p480_p11 = scmp.ne.s32.totalorder %s792_s13, %s479_s7  ;;  %p484_p2 = scmp.lt.u32.totalorder %s792_s13, %s857_s2 }
  0x6c   : > { %p485_p6 = scmp.lt.u32.totalorder %s483_s4, %s479_s7  ;;  %p487_p3 = scmp.lt.u32.totalorder %s479_s7, %s792_s13 }
  0x6d   : > { %p481_p13 = pnand %p480_p11, %p873_p5 }
  0x6e   : > { %p486_p9 = por %p485_p6, %p484_p2 }
  0x6f   : > { %p482_p1 = pneg %p481_p13 }
  0x70   : > { %p488_p8 = por %p487_p3, %p486_p9 }
  0x72   : > { %p489_p10 = pnand %p488_p8, %p482_p1 }
  0x74   : > { %492 = shalt.err (!%p489_p10)
}
  0x75   : > { %s596_s10 = smov 128   ;;  %s597_s12 = smov 8  }
  0x76   : > { %318 = dma.vmem_to_hbm [thread:$0]  (%p873_p5), %s787_s29, 256, %s792_s13, %s794_s0, %s596_s10, %s596_s10, %s597_s12  }
  0x77 PF: > { %p331_p12 = scmp.ge.s32.totalorder %s589_s28, 2  ;;  %s215_s22 = sand.u32 1, %s549_s19  }
  0x78   : > { %p874_p0 = scmp.ne.s32.totalorder %s869_s18, 0  ;;  %s216_s9 = scalar_lea.sflag [#allocation6], %s215_s22 }
  0x7a   : > { %p327_p4 = pnand %p331_p12, %p874_p0 }
  0x7c   : > { %544 = dma.done.wait (!%p327_p4), %s216_s9, 256  }
  0x7d   : > { %546 = vsyncadd (!%p327_p4), %s216_s9, 4294967040  ;;  %s22_s28 = sadd.s32 1, %s589_s28   ;;  %s875_s17 = sld [smem:[#allocation16_spill]] }
  0x7e   : > { %p19_p7 = scmp.ge.s32.totalorder %s22_s28, 8   ;;  %s876_s0 = sld [smem:[#allocation13_spill]] }
  0x7f   : > { %s877_s26 = sld [smem:[#allocation14_spill]]  ;;  %s878_s29 = sld [smem:[#allocation15_spill]] }
  0x80   : > { %s879_s19 = smov %s553_s20  ;;  %s880_s20 = smov %s557_s21 }
  0x81   : > { %s881_s21 = smov %s706_s15  ;;  %s882_s22 = smov %s565_s23 }
  0x82   : > { %s883_s23 = smov %s569_s24  ;;  %s885_s25 = smov %s585_s27 }
  0x83   : > { %s884_s24 = smov %s875_s17  ;;  %21 = sbr.rel (!%p19_p7) target bundleno = 21 (0x15), region = 69 }
  0x85   : > { %s886_s27 = smov %s878_s29 }
  0x8a   :  { %221 = vsyncpa [#allocation5], 1 }
  0x8b   :  { %223 = vsyncpa [#allocation5 + $0x1], 1 }
  0x8c   :  { %224 = vsyncpa [#allocation6], 1 }
  0x8d   :  { %226 = vsyncpa [#allocation6 + $0x1], 1 }

</bundles_post_ra>
